<compile_context>
chip_gen: v5e
topology: v5e:2x2
jax: 0.10.0
libtpu: 0.0.40
codegen_flags: <defaults>
</compile_context>

<pallas_src>
import jax
import jax.numpy as jnp
from jax import lax
from jax.experimental import pallas as pl
from jax.experimental.pallas import tpu as pltpu


def _sigmoid_f32(x):
    # Mathematically identical to sigmoid; tanh is a single EUP instruction.
    return 0.5 * (jnp.tanh(0.5 * x) + 1.0)


def autoencoder_kernel(x_ref, w1_ref, b1_ref,
                       wbin_ref, bbin_ref, wcont_ref, bcont_ref,
                       xbin_ref, xcont_ref):
    # Contract x[B, Din] with W[Dout, Din] over Din (PyTorch nn.Linear layout)
    # without materializing a transpose.
    dn = (((1,), (1,)), ((), ()))

    # encoder: fc1 + sigmoid   (bf16 MXU matmul, f32 accumulate, f32 sigmoid)
    h = lax.dot_general(x_ref[...], w1_ref[...], dimension_numbers=dn,
                        preferred_element_type=jnp.float32)
    h = _sigmoid_f32(h + b1_ref[...])                    # [TB, D_h] f32
    h_bf16 = h.astype(jnp.bfloat16)

    # binary head: fcBin + sigmoid
    ybin = lax.dot_general(h_bf16, wbin_ref[...], dimension_numbers=dn,
                           preferred_element_type=jnp.float32)
    xbin_ref[...] = _sigmoid_f32(ybin + bbin_ref[...]).astype(xbin_ref.dtype)

    # continuous head: fcCont (no sigmoid)
    ycont = lax.dot_general(h_bf16, wcont_ref[...], dimension_numbers=dn,
                            preferred_element_type=jnp.float32)
    xcont_ref[...] = (ycont + bcont_ref[...]).astype(xcont_ref.dtype)


def autoencoder_forward(x, w1, b1, wbin, bbin, wcont, bcont, *, tile_b=8):
    """x: [B, D_bin + D_cont] f32.  Returns (x_bin [B, D_bin], x_cont [B, D_cont]) f32."""
    B, D_in = x.shape
    D_h = w1.shape[0]
    D_bin = wbin.shape[0]
    D_cont = wcont.shape[0]

    # bf16 matmul operands (native MXU format, half the HBM traffic).
    x_bf = x.astype(jnp.bfloat16)
    w1_bf = w1.astype(jnp.bfloat16)
    wbin_bf = wbin.astype(jnp.bfloat16)
    wcont_bf = wcont.astype(jnp.bfloat16)

    # Biases as [1, N] f32 tiles (broadcast along the batch/sublane axis).
    b1_2d = b1.reshape(1, D_h).astype(jnp.float32)
    bbin_2d = bbin.reshape(1, D_bin).astype(jnp.float32)
    bcont_2d = bcont.reshape(1, D_cont).astype(jnp.float32)

    grid = (pl.cdiv(B, tile_b),)

    # Weights/biases: same block for every grid step -> fetched once, resident.
    resident = lambda shape: pl.BlockSpec(shape, lambda i: (0,) * len(shape))

    return pl.pallas_call(
        autoencoder_kernel,
        out_shape=(jax.ShapeDtypeStruct((B, D_bin), jnp.float32),
                   jax.ShapeDtypeStruct((B, D_cont), jnp.float32)),
        grid=grid,
        in_specs=[
            pl.BlockSpec((tile_b, D_in), lambda i: (i, 0)),   # x (batch-tiled)
            resident((D_h, D_in)),                            # W1
            resident((1, D_h)),                               # b1
            resident((D_bin, D_h)),                           # Wbin
            resident((1, D_bin)),                             # b_bin
            resident((D_cont, D_h)),                          # Wcont
            resident((1, D_cont)),                            # b_cont
        ],
        out_specs=(pl.BlockSpec((tile_b, D_bin), lambda i: (i, 0)),
                   pl.BlockSpec((tile_b, D_cont), lambda i: (i, 0))),
        compiler_params=pltpu.CompilerParams(
            dimension_semantics=("parallel",),      # 2nd TensorCore on v7x
            vmem_limit_bytes=32 * 1024 * 1024,      # explicit, safe on v7x's 64 MiB
        ),
    )(x_bf, w1_bf, b1_2d, wbin_bf, bbin_2d, wcont_bf, bcont_2d)


def reference_forward(x, w1, b1, wbin, bbin, wcont, bcont):
    h = jax.nn.sigmoid(x @ w1.T + b1)
    x_bin = jax.nn.sigmoid(h @ wbin.T + bbin)
    x_cont = h @ wcont.T + bcont
    return x_bin, x_cont


if __name__ == "__main__":
    # Small shapes consistent with the module; lane-dense (multiples of 128).
    batch = 16
    inputdimbin, inputdimcont, hiddendim = 128, 128, 128
    inputdim = inputdimbin + inputdimcont

    key = jax.random.PRNGKey(0)
    kx, kw1, kb1, kwb, kbb, kwc, kbc = jax.random.split(key, 7)

    x = jax.random.normal(kx, (batch, inputdim), dtype=jnp.float32)

    # Synthetic parameters following PyTorch nn.Linear layout: weight[out, in].
    w1 = jax.random.normal(kw1, (hiddendim, inputdim), dtype=jnp.float32) * 0.1
    b1 = jax.random.normal(kb1, (hiddendim,), dtype=jnp.float32) * 0.1
    wbin = jax.random.normal(kwb, (inputdimbin, hiddendim), dtype=jnp.float32) * 0.1
    bbin = jax.random.normal(kbb, (inputdimbin,), dtype=jnp.float32) * 0.1
    wcont = jax.random.normal(kwc, (inputdimcont, hiddendim), dtype=jnp.float32) * 0.1
    bcont = jax.random.normal(kbc, (inputdimcont,), dtype=jnp.float32) * 0.1

    out_bin, out_cont = autoencoder_forward(x, w1, b1, wbin, bbin, wcont, bcont)
    out_bin = jax.block_until_ready(out_bin)
    out_cont = jax.block_until_ready(out_cont)

    # Reference in f32 on the bf16-rounded operands (kernel quantizes matmul
    # inputs to bf16), tolerance loosened accordingly.
    def q(a):
        return a.astype(jnp.bfloat16).astype(jnp.float32)

    ref_bin, ref_cont = reference_forward(q(x), q(w1), b1, q(wbin), bbin, q(wcont), bcont)

    assert out_bin.shape == (batch, inputdimbin)
    assert out_cont.shape == (batch, inputdimcont)
    assert jnp.allclose(out_bin, ref_bin, atol=1e-2, rtol=1e-2), "binary head mismatch"
    assert jnp.allclose(out_cont, ref_cont, atol=1e-2, rtol=1e-2), "continuous head mismatch"

    print("KERNEL_OK")
</pallas_src>

<mosaic_0001>
module attributes {stable_mosaic.version = 11 : i64} {
  func.func @autoencoder_kernel(%arg0: i32, %arg1: memref<8x256xbf16, #tpu.memory_space<vmem>>, %arg2: memref<128x256xbf16, #tpu.memory_space<vmem>>, %arg3: memref<1x128xf32, #tpu.memory_space<vmem>>, %arg4: memref<128x128xbf16, #tpu.memory_space<vmem>>, %arg5: memref<1x128xf32, #tpu.memory_space<vmem>>, %arg6: memref<128x128xbf16, #tpu.memory_space<vmem>>, %arg7: memref<1x128xf32, #tpu.memory_space<vmem>>, %arg8: memref<8x128xf32, #tpu.memory_space<vmem>>, %arg9: memref<8x128xf32, #tpu.memory_space<vmem>>) attributes {dimension_semantics = [#tpu.dimension_semantics<parallel>], iteration_bounds = array<i64: 2>, scalar_prefetch = 0 : i64, scratch_operands = 0 : i64, tpu.core_type = #tpu.core_type<tc>, window_params = [{transform_indices = @transform_0, window_bounds = array<i64: 8, 256>}, {pipeline_mode = #tpu.pipeline_mode<synchronous>, transform_indices = @transform_1, window_bounds = array<i64: 128, 256>}, {pipeline_mode = #tpu.pipeline_mode<synchronous>, transform_indices = @transform_2, window_bounds = array<i64: 1, 128>}, {pipeline_mode = #tpu.pipeline_mode<synchronous>, transform_indices = @transform_3, window_bounds = array<i64: 128, 128>}, {pipeline_mode = #tpu.pipeline_mode<synchronous>, transform_indices = @transform_4, window_bounds = array<i64: 1, 128>}, {pipeline_mode = #tpu.pipeline_mode<synchronous>, transform_indices = @transform_5, window_bounds = array<i64: 128, 128>}, {pipeline_mode = #tpu.pipeline_mode<synchronous>, transform_indices = @transform_6, window_bounds = array<i64: 1, 128>}, {transform_indices = @transform_7, window_bounds = array<i64: 8, 128>}, {transform_indices = @transform_8, window_bounds = array<i64: 8, 128>}]} {
    %c0 = arith.constant 0 : index
    %c0_0 = arith.constant 0 : index
    %0 = vector.load %arg1[%c0, %c0_0] : memref<8x256xbf16, #tpu.memory_space<vmem>>, vector<8x256xbf16>
    %c0_1 = arith.constant 0 : index
    %c0_2 = arith.constant 0 : index
    %1 = vector.load %arg2[%c0_1, %c0_2] : memref<128x256xbf16, #tpu.memory_space<vmem>>, vector<128x256xbf16>
    %cst = arith.constant dense<0.000000e+00> : vector<8x128xf32>
    %2 = tpu.matmul %0, %1, %cst {dimension_numbers = #tpu.dot_dimension_numbers<[1], [1], [0], [0], [0, 0, 1, 0], [], []>} : vector<8x256xbf16>, vector<128x256xbf16>, vector<8x128xf32> -> vector<8x128xf32>
    %c0_3 = arith.constant 0 : index
    %c0_4 = arith.constant 0 : index
    %3 = vector.load %arg3[%c0_3, %c0_4] : memref<1x128xf32, #tpu.memory_space<vmem>>, vector<1x128xf32>
    %4 = vector.broadcast %3 : vector<1x128xf32> to vector<8x128xf32>
    %5 = arith.addf %2, %4 : vector<8x128xf32>
    %cst_5 = arith.constant 5.000000e-01 : f32
    %6 = vector.broadcast %cst_5 : f32 to vector<8x128xf32>
    %7 = arith.mulf %6, %5 : vector<8x128xf32>
    %8 = math.tanh %7 : vector<8x128xf32>
    %cst_6 = arith.constant 1.000000e+00 : f32
    %9 = vector.broadcast %cst_6 : f32 to vector<8x128xf32>
    %10 = arith.addf %8, %9 : vector<8x128xf32>
    %cst_7 = arith.constant 5.000000e-01 : f32
    %11 = vector.broadcast %cst_7 : f32 to vector<8x128xf32>
    %12 = arith.mulf %11, %10 : vector<8x128xf32>
    %13 = arith.truncf %12 : vector<8x128xf32> to vector<8x128xbf16>
    %c0_8 = arith.constant 0 : index
    %c0_9 = arith.constant 0 : index
    %14 = vector.load %arg4[%c0_8, %c0_9] : memref<128x128xbf16, #tpu.memory_space<vmem>>, vector<128x128xbf16>
    %cst_10 = arith.constant dense<0.000000e+00> : vector<8x128xf32>
    %15 = tpu.matmul %13, %14, %cst_10 {dimension_numbers = #tpu.dot_dimension_numbers<[1], [1], [0], [0], [0, 0, 1, 0], [], []>} : vector<8x128xbf16>, vector<128x128xbf16>, vector<8x128xf32> -> vector<8x128xf32>
    %c0_11 = arith.constant 0 : index
    %c0_12 = arith.constant 0 : index
    %16 = vector.load %arg5[%c0_11, %c0_12] : memref<1x128xf32, #tpu.memory_space<vmem>>, vector<1x128xf32>
    %17 = vector.broadcast %16 : vector<1x128xf32> to vector<8x128xf32>
    %18 = arith.addf %15, %17 : vector<8x128xf32>
    %cst_13 = arith.constant 5.000000e-01 : f32
    %19 = vector.broadcast %cst_13 : f32 to vector<8x128xf32>
    %20 = arith.mulf %19, %18 : vector<8x128xf32>
    %21 = math.tanh %20 : vector<8x128xf32>
    %cst_14 = arith.constant 1.000000e+00 : f32
    %22 = vector.broadcast %cst_14 : f32 to vector<8x128xf32>
    %23 = arith.addf %21, %22 : vector<8x128xf32>
    %cst_15 = arith.constant 5.000000e-01 : f32
    %24 = vector.broadcast %cst_15 : f32 to vector<8x128xf32>
    %25 = arith.mulf %24, %23 : vector<8x128xf32>
    %c0_16 = arith.constant 0 : index
    %c0_17 = arith.constant 0 : index
    %26 = vector.load %arg8[%c0_16, %c0_17] : memref<8x128xf32, #tpu.memory_space<vmem>>, vector<8x128xf32>
    tpu.vector_store %arg8[%c0_16, %c0_17], %25 {strides = array<i32>} : memref<8x128xf32, #tpu.memory_space<vmem>>, vector<8x128xf32>,
    %c0_18 = arith.constant 0 : index
    %c0_19 = arith.constant 0 : index
    %27 = vector.load %arg6[%c0_18, %c0_19] : memref<128x128xbf16, #tpu.memory_space<vmem>>, vector<128x128xbf16>
    %cst_20 = arith.constant dense<0.000000e+00> : vector<8x128xf32>
    %28 = tpu.matmul %13, %27, %cst_20 {dimension_numbers = #tpu.dot_dimension_numbers<[1], [1], [0], [0], [0, 0, 1, 0], [], []>} : vector<8x128xbf16>, vector<128x128xbf16>, vector<8x128xf32> -> vector<8x128xf32>
    %c0_21 = arith.constant 0 : index
    %c0_22 = arith.constant 0 : index
    %29 = vector.load %arg7[%c0_21, %c0_22] : memref<1x128xf32, #tpu.memory_space<vmem>>, vector<1x128xf32>
    %30 = vector.broadcast %29 : vector<1x128xf32> to vector<8x128xf32>
    %31 = arith.addf %28, %30 : vector<8x128xf32>
    %c0_23 = arith.constant 0 : index
    %c0_24 = arith.constant 0 : index
    %32 = vector.load %arg9[%c0_23, %c0_24] : memref<8x128xf32, #tpu.memory_space<vmem>>, vector<8x128xf32>
    tpu.vector_store %arg9[%c0_23, %c0_24], %31 {strides = array<i32>} : memref<8x128xf32, #tpu.memory_space<vmem>>, vector<8x128xf32>,
    return
  }
  func.func @transform_0(%arg0: i32) -> (i32, i32) {
    %c0_i32 = arith.constant 0 : i32
    %c0_i32_0 = arith.constant 0 : i32
    return %arg0, %c0_i32 : i32, i32
  }
  func.func @transform_1(%arg0: i32) -> (i32, i32) {
    %c0_i32 = arith.constant 0 : i32
    %c0_i32_0 = arith.constant 0 : i32
    %c0_i32_1 = arith.constant 0 : i32
    return %c0_i32, %c0_i32_0 : i32, i32
  }
  func.func @transform_2(%arg0: i32) -> (i32, i32) {
    %c0_i32 = arith.constant 0 : i32
    %c0_i32_0 = arith.constant 0 : i32
    %c0_i32_1 = arith.constant 0 : i32
    return %c0_i32, %c0_i32_0 : i32, i32
  }
  func.func @transform_3(%arg0: i32) -> (i32, i32) {
    %c0_i32 = arith.constant 0 : i32
    %c0_i32_0 = arith.constant 0 : i32
    %c0_i32_1 = arith.constant 0 : i32
    return %c0_i32, %c0_i32_0 : i32, i32
  }
  func.func @transform_4(%arg0: i32) -> (i32, i32) {
    %c0_i32 = arith.constant 0 : i32
    %c0_i32_0 = arith.constant 0 : i32
    %c0_i32_1 = arith.constant 0 : i32
    return %c0_i32, %c0_i32_0 : i32, i32
  }
  func.func @transform_5(%arg0: i32) -> (i32, i32) {
    %c0_i32 = arith.constant 0 : i32
    %c0_i32_0 = arith.constant 0 : i32
    %c0_i32_1 = arith.constant 0 : i32
    return %c0_i32, %c0_i32_0 : i32, i32
  }
  func.func @transform_6(%arg0: i32) -> (i32, i32) {
    %c0_i32 = arith.constant 0 : i32
    %c0_i32_0 = arith.constant 0 : i32
    %c0_i32_1 = arith.constant 0 : i32
    return %c0_i32, %c0_i32_0 : i32, i32
  }
  func.func @transform_7(%arg0: i32) -> (i32, i32) {
    %c0_i32 = arith.constant 0 : i32
    %c0_i32_0 = arith.constant 0 : i32
    return %arg0, %c0_i32 : i32, i32
  }
  func.func @transform_8(%arg0: i32) -> (i32, i32) {
    %c0_i32 = arith.constant 0 : i32
    %c0_i32_0 = arith.constant 0 : i32
    return %arg0, %c0_i32 : i32, i32
  }
}

</mosaic_0001>

<bundles_post_ra>
// kernel: tpu_custom_call.1
= control target key start
LH: loop header
LB: loop body
LE: loop exit
PB: predicated region body
PF: predicated region fallthrough
CT: control target
= control target key end

     0   :  { %s1605_s0 = inlined_call_operand.hbm [shape: bf16[16,256], index: 0, kind: input, shape index: {}]   ;;  %s1606_s1 = inlined_call_operand.hbm [shape: bf16[128,256], index: 1, kind: input, shape index: {}]   ;;  %s1607_s2 = inlined_call_operand.vmem [shape: f32[1,128], index: 2, kind: input, shape index: {}]   ;;  %s1608_s3 = inlined_call_operand.hbm [shape: bf16[128,128], index: 3, kind: input, shape index: {}]   ;;  %s1609_s4 = inlined_call_operand.vmem [shape: f32[1,128], index: 4, kind: input, shape index: {}]   ;;  %s1610_s5 = inlined_call_operand.hbm [shape: bf16[128,128], index: 5, kind: input, shape index: {}]   ;;  %s1611_s6 = inlined_call_operand.vmem [shape: f32[1,128], index: 6, kind: input, shape index: {}]   ;;  %s1612_s7 = inlined_call_operand.hbm [shape: f32[16,128], index: 7, kind: output, shape index: {0}]   ;;  %s1613_s8 = inlined_call_operand.hbm [shape: f32[16,128], index: 8, kind: output, shape index: {1}]  }
   0x1   :  { %1614 = sst [smem:[#allocation18_spill]] %s1606_s1 }
   0x2   :  { %1615 = sst [smem:[#allocation19_spill]] %s1608_s3 }
   0x3   :  { %14 = vsyncpa [#allocation3], 0 }
   0x4   :  { %16 = vsyncpa [#allocation3 + $0x1], 0 }
   0x5   :  { %17 = vsyncpa [#allocation6], 0 }
   0x6   :  { %18 = vsyncpa [#allocation9], 0 }
   0x7   :  { %19 = vsyncpa [#allocation4], 0 }
   0x8   :  { %21 = vsyncpa [#allocation4 + $0x1], 0 }
   0x9   :  { %22 = vsyncpa [#allocation12], 0 }
   0xa   :  { %24 = vsyncpa [#allocation12 + $0x1], 0  ;;  %s1415_s27 = smov 0   ;;  %s1417_s28 = smov 0  }
   0xb   :  { %s1419_s29 = smov 0   ;;  %s1421_s30 = smov 0  }
   0xc LB: > { %s1616_s1 = sld [smem:[#allocation18_spill]]  ;;  %s1439_s12 = sadd.s32 4294967295, %s1361_s30   ;;  %s1361_s30 = sphi %s1421_s30, %s1628_s30   ;;  %s1357_s29 = sphi %s1419_s29, %s1627_s29   ;;  %s1353_s28 = sphi %s1417_s28, %s1626_s28   ;;  %s1349_s27 = sphi %s1415_s27, %s1625_s27  }
   0xd   : > { %p860_p0 = scmp.ge.s32.totalorder %s1361_s30, 1  ;;  %p51_p1 = scmp.eq.s32.totalorder %s1439_s12, 0 }
   0xe   : > { %p239_p2 = scmp.lt.s32.totalorder %s1361_s30, 3  ;;  %s1363_s14 = smov [#allocation5]  }
   0xf   : > { %s252_s15 = sshll.u32 %s1363_s14, 4  ;;  %s1618_s3 = sld [smem:[#allocation19_spill]]  ;;  %s253_s15 = int_to_ptr.vmem [resolvable:$true] %s252_s15 }
  0x10   : > { %p1444_p3 = pnand %p860_p0, %p239_p2  ;;  %s1364_s20 = smov [#allocation7]  }
  0x11   : > { %s269_s21 = sshll.u32 %s1364_s20, 4  ;;  %s1365_s22 = smov 128   ;;  %s270_s21 = int_to_ptr.vmem [resolvable:$true] %s269_s21 }
  0x12   : > { %s250_s11 = sshll.u32 %s1616_s1, 4  ;;  %p1060_p4 = pneg %p1444_p3  ;;  %s251_s11 = int_to_ptr.hbm [resolvable:$true] %s250_s11 }
  0x13   : > { %s1366_s23 = smov 8   ;;  %s1367_s24 = smov 64  }
  0x14   : > { %p1456_p6 = pnand %p1060_p4, %p51_p1  ;;  %s1368_s25 = smov 4  }
  0x15   : > { %s267_s18 = sshll.u32 %s1618_s3, 4  ;;  %s284_s10 = sshll.u32 %s1610_s5, 4  ;;  %s268_s18 = int_to_ptr.hbm [resolvable:$true] %s267_s18  ;;  %s285_s10 = int_to_ptr.hbm [resolvable:$true] %s284_s10 }
  0x16   : > { %1063 = dma.hbm_to_vmem [thread:$0]  (!%p1456_p6), %s251_s11, 2048, %s253_s15, [#allocation6], %s1365_s22, %s1365_s22, %s1366_s23  }
  0x17   : > { %1066 = dma.hbm_to_vmem [thread:$0]  (!%p1456_p6), %s268_s18, 1024, %s270_s21, [#allocation6], %s1367_s24, %s1367_s24, %s1368_s25  }
  0x18   : > { %s1369_s14 = smov [#allocation8]   ;;  %s859_s11 = sadd.s32 4294967294, %s1361_s30  }
  0x19   : > { %s286_s16 = sshll.u32 %s1369_s14, 4  ;;  %s1471_s15 = sadd.s32 1, %s1361_s30   ;;  %s287_s16 = int_to_ptr.vmem [resolvable:$true] %s286_s16 }
  0x1a   : > { %1069 = dma.hbm_to_vmem [thread:$0]  (!%p1456_p6), %s285_s10, 1024, %s287_s16, [#allocation9], %s1367_s24, %s1367_s24, %s1368_s25  }
  0x1b   : > { %s37_s17 = sadd.s32 1, %s1357_s29  ;;  %s34_s18 = ssub.s32 %s1361_s30, %s1471_s15 }
  0x1c   : > { %p44_p7 = scmp.ne.s32.totalorder %s1357_s29, %s1353_s28  ;;  %p35_p8 = scmp.eq.s32.totalorder %s34_s18, 0 }
  0x1d   : > { %p45_p9 = scmp.eq.s32.totalorder %s1361_s30, 0  ;;  %p50_p10 = scmp.ne.s32.totalorder %s1353_s28, %s1349_s27 }
  0x1e   : > { %p200_p11 = scmp.eq.s32.totalorder %s1439_s12, 1  ;;  %p206_p0 = scmp.eq.s32.totalorder %s859_s11, 1 }
  0x1f   : > { %s1483_s20 = scalar_select %p35_p8, %s1357_s29, %s37_s17  }
  0x20   : > { %p1487_p12 = por %p51_p1, %p50_p10  ;;  %p1491_p13 = por %p200_p11, %p44_p7 }
  0x21   : > { %p46_p2 = por %p45_p9, %p44_p7  ;;  %s303_s22 = sand.u32 1, %s1357_s29  }
  0x22   : > { %p1496_p4 = por %p206_p0, %p50_p10  ;;  %p1084_p6 = scmp.lt.s32.totalorder %s1361_s30, 2 }
  0x23   : > { %s865_s24 = sshll.u32 %s303_s22, 3  ;;  %s1009_s25 = sshll.u32 %s1361_s30, 3 }
  0x24   : > { %s312_s10 = scalar_lea.hbm %s1605_s0, %s1009_s25  ;;  %s307_s16 = scalar_lea.vmem [#allocation2], %s865_s24 }
  0x25   : > { %s314_s14 = sshll.u32 %s312_s10, 4  ;;  %s316_s17 = sshll.u32 %s307_s16, 4  ;;  %s315_s14 = int_to_ptr.hbm [resolvable:$true] %s314_s14  ;;  %s317_s17 = int_to_ptr.vmem [resolvable:$true] %s316_s17 }
  0x26   : > { %p1505_p8 = pnand %p1084_p6, %p46_p2  ;;  %s304_s18 = scalar_lea.sflag [#allocation3], %s303_s22 }
  0x27   : > { %s1225_s1 = sshra.s32 %s315_s14, 4  ;;  %s1232_s24 = scalar_lea.hbm %s1605_s0, 16  ;;  %s1226_s1 = int_to_ptr.hbm [resolvable:$true] %s1225_s1 }
  0x28   : > { %s1227_s3 = scalar_lea.hbm %s1226_s1, 8  ;;  %p1229_p9 = pneg %p1505_p8 }
  0x29   : > { %p1228_p7 = scmp.ne.s32.totalorder %s1226_s1, %s1227_s3  ;;  %p1233_p0 = scmp.lt.s32.totalorder %s1226_s1, %s1605_s0 }
  0x2a   : > { %p1234_p2 = scmp.lt.s32.totalorder %s1232_s24, %s1227_s3 }
  0x2b   : > { %p1230_p10 = pnand %p1229_p9, %p1228_p7 }
  0x2c   : > { %p1235_p6 = por %p1234_p2, %p1233_p0 }
  0x2d   : > { %p1231_p11 = pneg %p1230_p10 }
  0x2f   : > { %p1236_p5 = pnand %p1235_p6, %p1231_p11 }
  0x31   : > { %1239 = shalt.err (!%p1236_p5)
}
  0x32   : > { %1073 = dma.hbm_to_vmem [thread:$0]  (!%p1505_p8), %s315_s14, 128, %s317_s17, %s304_s18  }
  0x33   : > { %325 = sbr.rel (%p1444_p3) target bundleno = 423 (0x1a7), region = 48  ;;  %s1522_s22 = sand.u32 (!%p1444_p3), 1, %s1353_s28  }
  0x34   : > { %s1525_s16 = sshll.u32 (!%p1444_p3), %s1522_s22, 3  ;;  %s328_s1 = scalar_lea.sflag (!%p1444_p3), [#allocation3], %s1522_s22 }
  0x35   : > { %s331_s3 = scalar_lea.vmem (!%p1444_p3), [#allocation2], %s1525_s16 }
  0x38   : > { %1328 = dma.done.wait (%p1487_p12), %s328_s1, 128  }
  0x39   : > { %1330 = vsyncadd (%p1487_p12), %s328_s1, 4294967168 }
  0x3a   : > { %1332 = dma.done.wait (%p51_p1), [#allocation6], 3072  }
  0x3b   : > { %1334 = vsyncadd (%p51_p1), [#allocation6], 4294964224 }
  0x3c   : > { %1336 = dma.done.wait (%p51_p1), [#allocation9], 1024  }
  0x3d   : > { %1338 = vsyncadd (%p51_p1), [#allocation9], 4294966272  ;;  %v933_v0 = vld [vmem:[#allocation5 + $0x70] sm:$0xf]  ;;  %v1025_v1 = vld [vmem:[#allocation5 + $0x74] sm:$0xf0] }
  0x3e   : > { %v1024_v2 = vld [vmem:[#allocation5 + $0x74] sm:$0xf]  ;;  %v934_v3 = vor.u32 %v1025_v1, %v933_v0  ;;  %v935_v4 = vld [vmem:[#allocation5 + $0x78] sm:$0xf0]  ;;  %v925_v6 = vld [vmem:[#allocation5 + $0x60] sm:$0xf] }
  0x3f   : > { %v938_v5 = vor.u32 %v1024_v2, %v935_v4  ;;  %v1023_v7 = vld [vmem:[#allocation5 + $0x64] sm:$0xf0]  ;;  %v1022_v8 = vld [vmem:[#allocation5 + $0x64] sm:$0xf]  ;;  %v927_v9 = vld [vmem:[#allocation5 + $0x68] sm:$0xf0] }
  0x40   : > { %493 = vmatpush.bf16.xpose.msra.mxu0 %v934_v3  ;;  %v926_v10 = vor.u32 %v1023_v7, %v925_v6  ;;  %v930_v11 = vor.u32 %v1022_v8, %v927_v9  ;;  %v917_v12 = vld [vmem:[#allocation5 + $0x50] sm:$0xf]  ;;  %v1021_v13 = vld [vmem:[#allocation5 + $0x54] sm:$0xf0]  ;;  %v1020_v14 = vld [vmem:[#allocation5 + $0x54] sm:$0xf] }
  0x41   : > { %506 = vmatpush.bf16.xpose.msra.mxu1 %v938_v5  ;;  %v919_v15 = vld [vmem:[#allocation5 + $0x58] sm:$0xf0]  ;;  %v918_v16 = vor.u32 %v1021_v13, %v917_v12  ;;  %v909_v18 = vld [vmem:[#allocation5 + $0x40] sm:$0xf]  ;;  %v1019_v19 = vld [vmem:[#allocation5 + $0x44] sm:$0xf0] }
  0x42   : > { %v922_v17 = vor.u32 %v1020_v14, %v919_v15  ;;  %v1018_v20 = vld [vmem:[#allocation5 + $0x44] sm:$0xf]  ;;  %v911_v21 = vld [vmem:[#allocation5 + $0x48] sm:$0xf0]  ;;  %v910_v22 = vor.u32 %v1019_v19, %v909_v18  ;;  %v901_v24 = vld [vmem:[#allocation5 + $0x30] sm:$0xf] }
  0x43   : > { %v914_v23 = vor.u32 %v1018_v20, %v911_v21  ;;  %v1017_v25 = vld [vmem:[#allocation5 + $0x34] sm:$0xf0]  ;;  %v1016_v26 = vld [vmem:[#allocation5 + $0x34] sm:$0xf]  ;;  %v903_v27 = vld [vmem:[#allocation5 + $0x38] sm:$0xf0] }
  0x44   : > { %v902_v28 = vor.u32 %v1017_v25, %v901_v24  ;;  %v906_v29 = vor.u32 %v1016_v26, %v903_v27  ;;  %v1033_v30 = vld [vmem:[#allocation7 + $0x38] sm:$0xff]  ;;  %v893_v32 = vld [vmem:[#allocation5 + $0x20] sm:$0xf]  ;;  %v1015_v33 = vld [vmem:[#allocation5 + $0x24] sm:$0xf0]  ;;  %s1005_s14 = sshll.u32 %s1439_s12, 3 }
  0x45   : > { %v1041_v31 = vld [vmem:[#allocation8 + $0x38] sm:$0xff]  ;;  %v1014_v34 = vld [vmem:[#allocation5 + $0x24] sm:$0xf]  ;;  %v895_v35 = vld [vmem:[#allocation5 + $0x28] sm:$0xf0]  ;;  %592 = vmatpush.bf16.xpose.msra.mxu2 %v1033_v30  ;;  %v894_v36 = vor.u32 %v1015_v33, %v893_v32  ;;  %s722_s18 = scalar_lea.hbm %s1613_s8, %s1005_s14  ;;  %s384_s10 = scalar_lea.vmem [#allocation11], %s1525_s16 }
  0x46   : > { %678 = vmatpush.bf16.xpose.msra.mxu3 %v1041_v31  ;;  %v898_v37 = vor.u32 %v1014_v34, %v895_v35  ;;  %v1032_v38 = vld [vmem:[#allocation7 + $0x30] sm:$0xff]  ;;  %v1013_v41 = vld [vmem:[#allocation5 + $0x14] sm:$0xf0]  ;;  %v887_v43 = vld [vmem:[#allocation5 + $0x18] sm:$0xf0]  ;;  %s724_s1 = sshll.u32 %s384_s10, 4  ;;  %s725_s1 = int_to_ptr.vmem [resolvable:$true] %s724_s1 }
  0x47   : > { %v1040_v39 = vld [vmem:[#allocation8 + $0x30] sm:$0xff]  ;;  %v1031_v46 = vld [vmem:[#allocation7 + $0x28] sm:$0xff]  ;;  %v877_v48 = vld [vmem:[#allocation5] sm:$0xf]  ;;  %s698_s13 = scalar_lea.sflag [#allocation12], %s1522_s22 }
  0x48   : > { %494 = vmatpush.bf16.xpose.msra.mxu0 %v926_v10  ;;  %v885_v40 = vld [vmem:[#allocation5 + $0x10] sm:$0xf]  ;;  %v1012_v42 = vld [vmem:[#allocation5 + $0x14] sm:$0xf]  ;;  %v1039_v47 = vld [vmem:[#allocation8 + $0x28] sm:$0xff] }
  0x49   : > { %507 = vmatpush.bf16.xpose.msra.mxu1 %v930_v11  ;;  %v886_v44 = vor.u32 %v1013_v41, %v885_v40  ;;  %v890_v45 = vor.u32 %v1012_v42, %v887_v43  ;;  %v1011_v49 = vld [vmem:[#allocation5 + $0x4] sm:$0xf0]  ;;  %v1010_v50 = vld [vmem:[#allocation5 + $0x4] sm:$0xf]  ;;  %v879_v51 = vld [vmem:[#allocation5 + $0x8] sm:$0xf0] }
  0x4a   : > { %v878_v52 = vor.u32 %v1011_v49, %v877_v48  ;;  %v385_v53 = vld [vmem:[%s331_s3] sm:$0xff]  ;;  %v882_v54 = vor.u32 %v1010_v50, %v879_v51  ;;  %v1030_v55 = vld [vmem:[#allocation7 + $0x20] sm:$0xff]  ;;  %v1027_v1 = vld [vmem:[#allocation7 + $0x8] sm:$0xff]  ;;  %s726_s3 = sshll.u32 %s722_s18, 4  ;;  %s1275_s18 = scalar_lea.hbm %s1613_s8, 16  ;;  %s727_s3 = int_to_ptr.hbm [resolvable:$true] %s726_s3 }
  0x4b   : > { %v1038_v56 = vld [vmem:[#allocation8 + $0x20] sm:$0xff]  ;;  %v407_v57 = vunpack.c.l.b16 %v385_v53  ;;  %v408_v58 = vunpack.c.h.b16 %v385_v53  ;;  %v1029_v61 = vld [vmem:[#allocation7 + $0x18] sm:$0xff]  ;;  %v1028_v63 = vld [vmem:[#allocation7 + $0x10] sm:$0xff]  ;;  %s1269_s19 = sshra.s32 %s727_s3, 4  ;;  %s1270_s19 = int_to_ptr.hbm [resolvable:$true] %s1269_s19 }
  0x4c   : > { %v1037_v62 = vld [vmem:[#allocation8 + $0x18] sm:$0xff]  ;;  %v1036_v0 = vld [vmem:[#allocation8 + $0x10] sm:$0xff]  ;;  %v1035_v2 = vld [vmem:[#allocation8 + $0x8] sm:$0xff]  ;;  %s1271_s17 = scalar_lea.hbm %s1270_s19, 8  ;;  %p1276_p12 = scmp.lt.s32.totalorder %s1270_s19, %s1613_s8 }
  0x4d   : > { %593 = vmatpush.bf16.xpose.msra.mxu2 %v1032_v38  ;;  %v409_v59 = vpack.c.b16 %v407_v57, %v407_v57  ;;  %v410_v60 = vpack.c.b16 %v408_v58, %v408_v58  ;;  %v1026_v3 = vld [vmem:[#allocation7] sm:$0xff]  ;;  %v1128_v5 = vld [vmem:[%s1607_s2] ss:$0 sm:$0xff]  ;;  %p1272_p1 = scmp.ne.s32.totalorder %s1270_s19, %s1271_s17  ;;  %p1277_p8 = scmp.lt.s32.totalorder %s1275_s18, %s1271_s17 }
  0x4e   : > { %679 = vmatpush.bf16.xpose.msra.mxu3 %v1040_v39  ;;  %v1034_v4 = vld [vmem:[#allocation8] sm:$0xff]  ;;  %v1130_v18 = vld [vmem:[%s1611_s6] ss:$0 sm:$0xff] }
  0x4f   : > { %p1273_p3 = pnand %p1272_p1, %p1491_p13  ;;  %p1278_p7 = por %p1277_p8, %p1276_p12 }
  0x50   : > { %495 = vmatpush.bf16.xpose.msra.mxu0 %v918_v16 }
  0x51   : > { %508 = vmatpush.bf16.xpose.msra.mxu1 %v922_v17  ;;  %v1129_v17 = vld [vmem:[%s1609_s4] ss:$0 sm:$0xff]  ;;  %p1274_p5 = pneg %p1273_p3 }
  0x53   : > { %p1279_p9 = pnand %p1278_p7, %p1274_p5 }
  0x55   : > { %594 = vmatpush.bf16.xpose.msra.mxu2 %v1031_v46 }
  0x56   : > { %680 = vmatpush.bf16.xpose.msra.mxu3 %v1039_v47 }
  0x58   : > { %496 = vmatpush.bf16.xpose.msra.mxu0 %v910_v22 }
  0x59   : > { %509 = vmatpush.bf16.xpose.msra.mxu1 %v914_v23 }
  0x5d   : > { %595 = vmatpush.bf16.xpose.msra.mxu2 %v1030_v55 }
  0x5e   : > { %681 = vmatpush.bf16.xpose.msra.mxu3 %v1038_v56 }
  0x60   : > { %497 = vmatpush.bf16.xpose.msra.mxu0 %v902_v28 }
  0x61   : > { %510 = vmatpush.bf16.xpose.msra.mxu1 %v906_v29 }
  0x65   : > { %596 = vmatpush.bf16.xpose.msra.mxu2 %v1029_v61 }
  0x66   : > { %682 = vmatpush.bf16.xpose.msra.mxu3 %v1037_v62 }
  0x68   : > { %498 = vmatpush.bf16.xpose.msra.mxu0 %v894_v36 }
  0x69   : > { %511 = vmatpush.bf16.xpose.msra.mxu1 %v898_v37 }
  0x6d   : > { %597 = vmatpush.bf16.xpose.msra.mxu2 %v1028_v63 }
  0x6e   : > { %683 = vmatpush.bf16.xpose.msra.mxu3 %v1036_v0 }
  0x70   : > { %499 = vmatpush.bf16.xpose.msra.mxu0 %v886_v44 }
  0x71   : > { %512 = vmatpush.bf16.xpose.msra.mxu1 %v890_v45 }
  0x75   : > { %598 = vmatpush.bf16.xpose.msra.mxu2 %v1027_v1 }
  0x76   : > { %684 = vmatpush.bf16.xpose.msra.mxu3 %v1035_v2 }
  0x78   : > { %500 = vmatpush.bf16.xpose.msra.mxu0 %v878_v52 }
  0x79   : > { %513 = vmatpush.bf16.xpose.msra.mxu1 %v882_v54 }
  0x7d   : > { %599 = vmatpush.bf16.xpose.msra.mxu2 %v1026_v3 }
  0x7e   : > { %685 = vmatpush.bf16.xpose.msra.mxu3 %v1034_v4 }
  0x7f   : > { %501 = vmatmul.bf16.vlgmr.msra.gmra.mxu0 %v409_v59 }
  0x80   : > { %514 = vmatmul.bf16.vlgmr.msra.gmra.mxu1 %v410_v60 }
  0xfc   : > { %v502_v6 = vpop.f32.mrf.mxu0 }
  0xfd   : > { %v503_v7 = vadd.f32 %v1128_v5, %v502_v6  ;;  %v515_v8 = vpop.f32.mrf.mxu1 }
  0xff   : > { %v516_v9 = vadd.f32 %v515_v8, %v503_v7 }
 0x101   : > { %v519_v10 = vmul.f32 0.5, %v516_v9 }
 0x103   : > { %1131 = vtanh.f32 %v519_v10 }
 0x104   : > { %v504_v11 = vpop.f32.mrf.mxu0 }
 0x105   : > { %v517_v12 = vpop.f32.mrf.mxu1 }
 0x109   : > { %v1132_v13 = vpop.eup %1131 }
 0x10a   : > { %v521_v14 = vadd.f32 1.0, %v1132_v13 }
 0x10c   : > { %v522_v15 = vmul.f32 0.5, %v521_v14 }
 0x10e   : > { %v523_v16 = vpack.c.bf16 %v522_v15, %v522_v15 }
 0x110   : > { %600 = vmatmul.bf16.vlgmr.msra.gmra.mxu2 %v523_v16  ;;  %686 = vmatmul.bf16.vlgmr.msra.gmra.mxu3 %v523_v16 }
 0x193   : > { %v601_v19 = vpop.f32.mrf.mxu2  ;;  %v687_v20 = vpop.f32.mrf.mxu3 }
 0x194   : > { %v602_v21 = vadd.f32 %v1129_v17, %v601_v19  ;;  %v688_v22 = vadd.f32 %v1130_v18, %v687_v20 }
 0x196   : > { %v605_v23 = vmul.f32 0.5, %v602_v21  ;;  %691 = vst [vmem:[%s384_s10] sm:$0xff] %v688_v22 }
 0x197   : > { %1282 = shalt.err (!%p1279_p9)
}
 0x198   : > { %1057 = dma.vmem_to_hbm [thread:$0]  (%p1491_p13), %s725_s1, 128, %s727_s3, %s698_s13   ;;  %1133 = vtanh.f32 %v605_v23 }
 0x199   : > { %s708_s11 = scalar_lea.hbm %s1612_s7, %s1005_s14  ;;  %s377_s19 = scalar_lea.vmem [#allocation10], %s1525_s16 }
 0x19a   : > { %s710_s17 = sshll.u32 %s377_s19, 4  ;;  %s712_s25 = sshll.u32 %s708_s11, 4  ;;  %s711_s17 = int_to_ptr.vmem [resolvable:$true] %s710_s17  ;;  %s713_s25 = int_to_ptr.hbm [resolvable:$true] %s712_s25 }
 0x19b   : > { %v603_v24 = vpop.f32.mrf.mxu2  ;;  %v689_v25 = vpop.f32.mrf.mxu3  ;;  %s693_s18 = scalar_lea.sflag [#allocation4], %s1522_s22  ;;  %s1297_s1 = sshra.s32 %s713_s25, 4  ;;  %s1298_s1 = int_to_ptr.hbm [resolvable:$true] %s1297_s1 }
 0x19c   : > { %s1299_s3 = scalar_lea.hbm %s1298_s1, 8  ;;  %s1303_s14 = scalar_lea.hbm %s1612_s7, 16 }
 0x19d   : > { %p1300_p10 = scmp.ne.s32.totalorder %s1298_s1, %s1299_s3  ;;  %p1304_p2 = scmp.lt.s32.totalorder %s1298_s1, %s1612_s7 }
 0x19e   : > { %v1134_v26 = vpop.eup %1133  ;;  %p1305_p6 = scmp.lt.s32.totalorder %s1303_s14, %s1299_s3 }
 0x19f   : > { %v607_v27 = vadd.f32 1.0, %v1134_v26  ;;  %p1301_p11 = pnand %p1300_p10, %p1491_p13 }
 0x1a0   : > { %p1306_p1 = por %p1305_p6, %p1304_p2 }
 0x1a1   : > { %v608_v28 = vmul.f32 0.5, %v607_v27  ;;  %p1302_p0 = pneg %p1301_p11 }
 0x1a3   : > { %609 = vst [vmem:[%s377_s19] sm:$0xff] %v608_v28  ;;  %p1307_p3 = pnand %p1306_p1, %p1302_p0 }
 0x1a5   : > { %1310 = shalt.err (!%p1307_p3)
}
 0x1a6   : > { %1056 = dma.vmem_to_hbm [thread:$0]  (%p1491_p13), %s711_s17, 128, %s713_s25, %s693_s18  }
 0x1a7 PF: > { %s738_s22 = sand.u32 1, %s1349_s27   ;;  %p1624_p5 = scmp.ge.s32.totalorder %s1361_s30, 2 }
 0x1a8   : > { %s739_s24 = scalar_lea.sflag [#allocation4], %s738_s22 }
 0x1a9   : > { %p1075_p12 = pnand %p1624_p5, %p1496_p4 }
 0x1ab   : > { %p1076_p8 = pneg %p1075_p12 }
 0x1ad   : > { %1340 = dma.done.wait (%p1076_p8), %s739_s24, 128  }
 0x1ae   : > { %1342 = vsyncadd (%p1076_p8), %s739_s24, 4294967168  ;;  %s749_s9 = scalar_lea.sflag [#allocation12], %s738_s22 }
 0x1af   : > { %1344 = dma.done.wait (%p1076_p8), %s749_s9, 128  }
 0x1b0   : > { %1346 = vsyncadd (%p1076_p8), %s749_s9, 4294967168  ;;  %p27_p13 = scmp.ge.s32.totalorder %s1471_s15, 4   ;;  %s1625_s27 = smov %s1353_s28 }
 0x1b1   : > { %s1626_s28 = smov %s1357_s29  ;;  %s1627_s29 = smov %s1483_s20 }
 0x1b2   : > { %s1628_s30 = smov %s1471_s15  ;;  %29 = sbr.rel (!%p27_p13) target bundleno = 12 (0xc), region = 122 }
 0x1b7   :  { %755 = vsyncpa [#allocation3], 1 }
 0x1b8   :  { %757 = vsyncpa [#allocation3 + $0x1], 1 }
 0x1b9   :  { %758 = vsyncpa [#allocation6], 1 }
 0x1ba   :  { %759 = vsyncpa [#allocation9], 1 }
 0x1bb   :  { %760 = vsyncpa [#allocation4], 1 }
 0x1bc   :  { %762 = vsyncpa [#allocation4 + $0x1], 1 }
 0x1bd   :  { %763 = vsyncpa [#allocation12], 1 }
 0x1be   :  { %765 = vsyncpa [#allocation12 + $0x1], 1 }

</bundles_post_ra>
